<compile_context>
chip_gen: v6e
topology: v6e:2x2x1
jax: 0.10.0
libtpu: 0.0.40
codegen_flags: <defaults>
</compile_context>

<pallas_src>
import math

import jax
import jax.numpy as jnp
from jax import lax
from jax.experimental import pallas as pl
from jax.experimental.pallas import tpu as pltpu


def _round_up(x, m):
    return ((x + m - 1) // m) * m


def _vmem_plan():
    """Return (vmem_limit_bytes for the compiler, tile-sizing budget)."""
    cap = 128 * 1024 * 1024  # v5e / v6e physical per-core VMEM fallback
    try:
        info = pltpu.get_tpu_info()
        cap = int(getattr(info, "vmem_capacity_bytes", cap)) or cap
    except Exception:
        pass
    # ~15% headroom for DMA queues / compiler-internal scratch:
    #   64 MiB (v7x) -> ~54 MiB limit;  128 MiB (v5e/v6e) -> ~108 MiB limit.
    limit = int(cap * 0.85)
    # Budget handed to the tile-size chooser; extra slack for regalloc.
    budget = int(limit * 0.85)
    return limit, budget


def _num_tensorcores():
    try:
        info = pltpu.get_tpu_info()
        for name in ("num_cores", "core_count", "tensorcore_count",
                     "num_tensorcores", "cores_per_chip"):
            n = getattr(info, name, None)
            if isinstance(n, int) and n > 0:
                return int(n)
    except Exception:
        pass
    return 1  # single-TC default (v5e / v6e)


def _eup_supports_bf16():
    # bf16 EUP exists on v6e / v7x, not on v5e.
    try:
        kind = jax.devices()[0].device_kind.lower()
        return ("v6" in kind) or ("v7" in kind)
    except Exception:
        return False


def _choose_group(n_heads, ch, t_pad, itemsize, budget_bytes, n_batches, num_cores):
    """Largest head-group G (divisor of n_heads) whose VMEM footprint fits."""
    per_head = (
        # q, k, v and out tiles, double-buffered by the BlockSpec pipeline.
        2 * 4 * ch * t_pad * itemsize
        # f32 scores w and f32 (w - max)/exp live simultaneously, plus the
        # input-dtype copy p feeding the second matmul.
        + t_pad * t_pad * (4 + 4 + itemsize)
        # f32 (ch+1, T) accumulator + ones-augmented V copy.
        + (ch + 1) * t_pad * (4 + itemsize)
    )
    g = max(1, int(budget_bytes // max(per_head, 1)))
    g = min(g, n_heads)
    while n_heads % g:
        g -= 1
    # Multi-TC chips (v7x): prefer a total grid length that's a multiple of the
    # core count so megacore sharding keeps both cores busy on the last step.
    # On single-TC v5e/v6e the grid is a serial loop -> keep G maximal.
    if num_cores > 1:
        for cand in range(g, max(0, g // 2), -1):
            if n_heads % cand == 0 and (n_batches * (n_heads // cand)) % num_cores == 0:
                g = cand
                break
    return g


def _make_attn_kernel(scale, t_valid, t_pad, exp_dtype, approx_recip):
    """scale = 1/sqrt(ch): applied once to q (== the reference's two ch**-0.25)."""

    def attn_kernel(q_ref, k_ref, v_ref, o_ref):
        # Blocks are (G, C, Tp): a group of G heads of one batch element.
        q = q_ref[...]
        k = k_ref[...]
        v = v_ref[...]

        # Full 1/sqrt(ch) scale applied once; weak scalar keeps the input dtype.
        q = q * scale

        # scores[g, t, s] = sum_c q[g, c, t] * k[g, c, s]
        # Contraction over channels, batched over heads: no transposes, f32 acc.
        w = lax.dot_general(
            q, k,
            dimension_numbers=(((1,), (1,)), ((0,), (0,))),
            preferred_element_type=jnp.float32,
        )  # (G, Tp, Tp) f32

        # Padded key columns (lane padding of T) must not receive probability.
        if t_valid != t_pad:
            key_ids = lax.broadcasted_iota(jnp.int32, (1, t_pad), 1)
            w = jnp.where(key_ids < t_valid, w, float("-inf"))

        # Numerically stable exp; normalization deferred to the (C, T) output.
        w_max = jnp.max(w, axis=-1, keepdims=True)        # only remaining XLU reduce
        x = w - w_max
        if exp_dtype != jnp.float32:
            # bf16 exp ~doubles EUP throughput (v6e/v7x); only taken when the
            # surrounding pipeline is already bf16.
            x = x.astype(exp_dtype)
        p = jnp.exp(x).astype(v.dtype)                    # (G, Tp, Tp)

        # Fold the softmax row-sum into the V matmul: append a row of ones to V
        # so the denominator is the extra output row (rides the MXU instead of
        # an XLU cross-lane reduction).
        ones_row = jnp.ones((v.shape[0], 1, v.shape[2]), dtype=v.dtype)
        v_aug = jnp.concatenate([v, ones_row], axis=1)    # (G, C+1, Tp)

        # a_aug[g, c, t] = sum_s v_aug[g, c, s] * p[g, t, s]   (no w.T copy)
        a_aug = lax.dot_general(
            v_aug, p,
            dimension_numbers=(((2,), (2,)), ((0,), (0,))),
            preferred_element_type=jnp.float32,
        )  # (G, C+1, Tp) f32

        num = a_aug[:, :-1, :]                            # (G, C, Tp)
        den = a_aug[:, -1:, :]                            # (G, 1, Tp) row sums
        # Deferred normalization: C*T multiplies instead of T*T divides.
        inv = pl.reciprocal(den, approx=approx_recip)     # EUP slot
        o_ref[...] = (num * inv).astype(o_ref.dtype)

    return attn_kernel


def qkv_attention(qkv, n_heads):
    """qkv: [N, 3*H*C, T] -> [N, H*C, T]  (matches QKVAttention.forward)."""
    bs, width, length = qkv.shape
    assert width % (3 * n_heads) == 0
    ch = width // (3 * n_heads)
    scale = 1.0 / math.sqrt(ch)  # == (ch ** -0.25) ** 2 applied to q only

    dtype = qkv.dtype
    itemsize = jnp.dtype(dtype).itemsize

    # Lane-dense sequence axis: pad T to a multiple of 128 and mask padded keys
    # with -inf inside the kernel (padded query rows are sliced off afterwards).
    t_pad = _round_up(length, 128)
    if t_pad != length:
        qkv = jnp.pad(qkv, ((0, 0), (0, 0), (0, t_pad - length)))

    # Layout-preserving (free) view exposing (chunk, head, channel) structure so
    # the kernel reads q/k/v straight from the fused buffer — no strided HBM
    # slice copies in the wrapper.
    qkv5 = qkv.reshape(bs, 3, n_heads, ch, t_pad)

    vmem_limit, budget = _vmem_plan()
    num_cores = _num_tensorcores()
    G = _choose_group(n_heads, ch, t_pad, itemsize, budget, bs, num_cores)
    n_hgroups = n_heads // G

    blk = (None, None, G, ch, t_pad)
    q_spec = pl.BlockSpec(blk, lambda n, h: (n, 0, h, 0, 0))
    k_spec = pl.BlockSpec(blk, lambda n, h: (n, 1, h, 0, 0))
    v_spec = pl.BlockSpec(blk, lambda n, h: (n, 2, h, 0, 0))
    o_spec = pl.BlockSpec((None, G, ch, t_pad), lambda n, h: (n, h, 0, 0))

    cost = pl.CostEstimate(
        flops=4 * bs * n_heads * ch * t_pad * t_pad,        # two matmuls, ~2*C*T*T each
        transcendentals=bs * n_heads * t_pad * t_pad,       # exp over the score matrix
        bytes_accessed=4 * bs * n_heads * ch * t_pad * itemsize,
    )

    exp_dtype = (jnp.bfloat16
                 if (jnp.dtype(dtype) == jnp.dtype(jnp.bfloat16) and _eup_supports_bf16())
                 else jnp.float32)
    approx_recip = jnp.dtype(dtype) != jnp.dtype(jnp.float32)

    out = pl.pallas_call(
        _make_attn_kernel(scale, length, t_pad, exp_dtype, approx_recip),
        out_shape=jax.ShapeDtypeStruct((bs, n_heads, ch, t_pad), dtype),
        grid=(bs, n_hgroups),
        in_specs=[q_spec, k_spec, v_spec],
        out_specs=o_spec,
        compiler_params=pltpu.CompilerParams(
            dimension_semantics=("parallel", "parallel"),
            vmem_limit_bytes=vmem_limit,
        ),
        cost_estimate=cost,
    )(qkv5, qkv5, qkv5)

    out = out.reshape(bs, n_heads * ch, t_pad)
    if t_pad != length:
        out = out[:, :, :length]
    return out


def qkv_attention_ref(qkv, n_heads):
    """Pure-JAX reference mirroring the PyTorch forward exactly."""
    bs, width, length = qkv.shape
    ch = width // (3 * n_heads)
    scale = 1.0 / math.sqrt(math.sqrt(ch))
    q, k, v = jnp.split(qkv, 3, axis=1)
    q = q.reshape(bs * n_heads, ch, length)
    k = k.reshape(bs * n_heads, ch, length)
    v = v.reshape(bs * n_heads, ch, length)
    w = jnp.einsum('bct,bcs->bts', q * scale, k * scale)
    w = jax.nn.softmax(w.astype(jnp.float32), axis=-1).astype(w.dtype)
    a = jnp.einsum('bts,bcs->bct', w, v)
    return a.reshape(bs, -1, length)


if __name__ == "__main__":
    root = jax.random.PRNGKey(0)
    k1, k2 = jax.random.split(root)

    # Case 1: lane-dense T (multiple of 128).
    N, H, C, T = 2, 2, 16, 128                  # width = 3*H*C = 96
    qkv = jax.random.normal(k1, (N, 3 * H * C, T), dtype=jnp.float32)
    out = jax.block_until_ready(qkv_attention(qkv, n_heads=H))
    ref = qkv_attention_ref(qkv, n_heads=H)
    assert out.shape == (N, H * C, T)
    err = float(jnp.max(jnp.abs(out - ref)))
    assert jnp.allclose(out, ref, atol=1e-4, rtol=1e-4), err

    # Case 2: T not a multiple of 128 -> exercises padding + key masking path.
    N2, H2, C2, T2 = 1, 2, 8, 80                # width = 3*H2*C2 = 48
    qkv2 = jax.random.normal(k2, (N2, 3 * H2 * C2, T2), dtype=jnp.float32)
    out2 = jax.block_until_ready(qkv_attention(qkv2, n_heads=H2))
    ref2 = qkv_attention_ref(qkv2, n_heads=H2)
    assert out2.shape == (N2, H2 * C2, T2)
    err2 = float(jnp.max(jnp.abs(out2 - ref2)))
    assert jnp.allclose(out2, ref2, atol=1e-4, rtol=1e-4), err2

    print("KERNEL_OK")
</pallas_src>

<mosaic_0001>
module attributes {stable_mosaic.version = 11 : i64} {
  func.func @attn_kernel(%arg0: i32, %arg1: i32, %arg2: memref<1x1x2x16x128xf32, #tpu.memory_space<vmem>>, %arg3: memref<1x1x2x16x128xf32, #tpu.memory_space<vmem>>, %arg4: memref<1x1x2x16x128xf32, #tpu.memory_space<vmem>>, %arg5: memref<1x2x16x128xf32, #tpu.memory_space<vmem>>) attributes {dimension_semantics = [#tpu.dimension_semantics<parallel>, #tpu.dimension_semantics<parallel>], iteration_bounds = array<i64: 2, 1>, scalar_prefetch = 0 : i64, scratch_operands = 0 : i64, tpu.core_type = #tpu.core_type<tc>, window_params = [{transform_indices = @transform_0, window_bounds = array<i64: 1, 1, 2, 16, 128>}, {transform_indices = @transform_1, window_bounds = array<i64: 1, 1, 2, 16, 128>}, {transform_indices = @transform_2, window_bounds = array<i64: 1, 1, 2, 16, 128>}, {transform_indices = @transform_3, window_bounds = array<i64: 1, 2, 16, 128>}]} {
    %c0 = arith.constant 0 : index
    %c0_0 = arith.constant 0 : index
    %c0_1 = arith.constant 0 : index
    %c0_2 = arith.constant 0 : index
    %c0_3 = arith.constant 0 : index
    %0 = vector.load %arg2[%c0, %c0_0, %c0_1, %c0_2, %c0_3] : memref<1x1x2x16x128xf32, #tpu.memory_space<vmem>>, vector<1x1x2x16x128xf32>
    %1 = vector.shape_cast %0 : vector<1x1x2x16x128xf32> to vector<2x16x128xf32>
    %c0_4 = arith.constant 0 : index
    %c0_5 = arith.constant 0 : index
    %c0_6 = arith.constant 0 : index
    %c0_7 = arith.constant 0 : index
    %c0_8 = arith.constant 0 : index
    %2 = vector.load %arg3[%c0_4, %c0_5, %c0_6, %c0_7, %c0_8] : memref<1x1x2x16x128xf32, #tpu.memory_space<vmem>>, vector<1x1x2x16x128xf32>
    %3 = vector.shape_cast %2 : vector<1x1x2x16x128xf32> to vector<2x16x128xf32>
    %c0_9 = arith.constant 0 : index
    %c0_10 = arith.constant 0 : index
    %c0_11 = arith.constant 0 : index
    %c0_12 = arith.constant 0 : index
    %c0_13 = arith.constant 0 : index
    %4 = vector.load %arg4[%c0_9, %c0_10, %c0_11, %c0_12, %c0_13] : memref<1x1x2x16x128xf32, #tpu.memory_space<vmem>>, vector<1x1x2x16x128xf32>
    %5 = vector.shape_cast %4 : vector<1x1x2x16x128xf32> to vector<2x16x128xf32>
    %cst = arith.constant 2.500000e-01 : f32
    %6 = vector.broadcast %cst : f32 to vector<2x16x128xf32>
    %7 = arith.mulf %1, %6 : vector<2x16x128xf32>
    %cst_14 = arith.constant dense<0.000000e+00> : vector<2x128x128xf32>
    %8 = tpu.matmul %7, %3, %cst_14 {dimension_numbers = #tpu.dot_dimension_numbers<[1], [1], [2], [2], [0, 0, 0, 2, 1, 2], [0], [0]>} : vector<2x16x128xf32>, vector<2x16x128xf32>, vector<2x128x128xf32> -> vector<2x128x128xf32>
    %cst_15 = arith.constant dense<0xFF800000> : vector<2x128xf32>
    %9 = vector.multi_reduction <maximumf>, %8, %cst_15 [2] : vector<2x128x128xf32> to vector<2x128xf32>
    %10 = vector.shape_cast %9 : vector<2x128xf32> to vector<2x128x1xf32>
    %11 = vector.broadcast %10 : vector<2x128x1xf32> to vector<2x128x128xf32>
    %12 = arith.subf %8, %11 : vector<2x128x128xf32>
    %13 = math.exp %12 : vector<2x128x128xf32>
    %cst_16 = arith.constant 1.000000e+00 : f32
    %14 = vector.broadcast %cst_16 : f32 to vector<2x1x128xf32>
    %15 = tpu.concatenate %5, %14 in 1 : vector<2x16x128xf32>, vector<2x1x128xf32> -> vector<2x17x128xf32>
    %cst_17 = arith.constant dense<0.000000e+00> : vector<2x17x128xf32>
    %16 = tpu.matmul %15, %13, %cst_17 {dimension_numbers = #tpu.dot_dimension_numbers<[2], [2], [1], [1], [0, 0, 0, 1, 1, 1], [0], [0]>} : vector<2x17x128xf32>, vector<2x128x128xf32>, vector<2x17x128xf32> -> vector<2x17x128xf32>
    %17 = vector.extract_strided_slice %16 {offsets = [0, 0, 0], sizes = [2, 16, 128], strides = [1, 1, 1]} : vector<2x17x128xf32> to vector<2x16x128xf32>
    %18 = vector.extract_strided_slice %16 {offsets = [0, 16, 0], sizes = [2, 1, 128], strides = [1, 1, 1]} : vector<2x17x128xf32> to vector<2x1x128xf32>
    %19 = tpu.reciprocal %18 : vector<2x1x128xf32> -> vector<2x1x128xf32>
    %20 = vector.broadcast %19 : vector<2x1x128xf32> to vector<2x16x128xf32>
    %21 = arith.mulf %17, %20 : vector<2x16x128xf32>
    %c0_18 = arith.constant 0 : index
    %c0_19 = arith.constant 0 : index
    %c0_20 = arith.constant 0 : index
    %c0_21 = arith.constant 0 : index
    %22 = vector.load %arg5[%c0_18, %c0_19, %c0_20, %c0_21] : memref<1x2x16x128xf32, #tpu.memory_space<vmem>>, vector<1x2x16x128xf32>
    %23 = vector.shape_cast %22 : vector<1x2x16x128xf32> to vector<2x16x128xf32>
    %24 = vector.shape_cast %21 : vector<2x16x128xf32> to vector<1x2x16x128xf32>
    tpu.vector_store %arg5[%c0_18, %c0_19, %c0_20, %c0_21], %24 {strides = array<i32>} : memref<1x2x16x128xf32, #tpu.memory_space<vmem>>, vector<1x2x16x128xf32>,
    return
  }
  func.func @transform_0(%arg0: i32, %arg1: i32) -> (i32, i32, i32, i32, i32) {
    %c0_i32 = arith.constant 0 : i32
    %c0_i32_0 = arith.constant 0 : i32
    %c0_i32_1 = arith.constant 0 : i32
    %c0_i32_2 = arith.constant 0 : i32
    return %arg0, %c0_i32, %arg1, %c0_i32_0, %c0_i32_1 : i32, i32, i32, i32, i32
  }
  func.func @transform_1(%arg0: i32, %arg1: i32) -> (i32, i32, i32, i32, i32) {
    %c1_i32 = arith.constant 1 : i32
    %c0_i32 = arith.constant 0 : i32
    %c0_i32_0 = arith.constant 0 : i32
    %c0_i32_1 = arith.constant 0 : i32
    return %arg0, %c1_i32, %arg1, %c0_i32, %c0_i32_0 : i32, i32, i32, i32, i32
  }
  func.func @transform_2(%arg0: i32, %arg1: i32) -> (i32, i32, i32, i32, i32) {
    %c2_i32 = arith.constant 2 : i32
    %c0_i32 = arith.constant 0 : i32
    %c0_i32_0 = arith.constant 0 : i32
    %c0_i32_1 = arith.constant 0 : i32
    return %arg0, %c2_i32, %arg1, %c0_i32, %c0_i32_0 : i32, i32, i32, i32, i32
  }
  func.func @transform_3(%arg0: i32, %arg1: i32) -> (i32, i32, i32, i32) {
    %c0_i32 = arith.constant 0 : i32
    %c0_i32_0 = arith.constant 0 : i32
    %c0_i32_1 = arith.constant 0 : i32
    return %arg0, %arg1, %c0_i32, %c0_i32_0 : i32, i32, i32, i32
  }
}

</mosaic_0001>

<bundles_post_ra>
// kernel: tpu_custom_call.1
= control target key start
LH: loop header
LB: loop body
LE: loop exit
PB: predicated region body
PF: predicated region fallthrough
CT: control target
= control target key end

     0   :  { %s2275_s0 = inlined_call_operand.hbm [shape: f32[2,3,2,16,128], index: 0, kind: input, shape index: {}]   ;;  %s2276_s1 = inlined_call_operand.hbm [shape: f32[2,3,2,16,128], index: 1, kind: input, shape index: {}]   ;;  %s2277_s2 = inlined_call_operand.hbm [shape: f32[2,3,2,16,128], index: 2, kind: input, shape index: {}]   ;;  %s2278_s3 = inlined_call_operand.hbm [shape: f32[2,2,16,128], index: 3, kind: output, shape index: {}]  }
   0x1   :  { %2283 = sst [smem:[#allocation15_spill]] %s2275_s0 }
   0x2   :  { %2284 = sst [smem:[#allocation16_spill]] %s2276_s1 }
   0x3   :  { %8 = vsyncpa [#allocation3], 0 }
   0x4   :  { %10 = vsyncpa [#allocation3 + $0x1], 0 }
   0x5   :  { %11 = vsyncpa [#allocation6], 0 }
   0x6   :  { %13 = vsyncpa [#allocation6 + $0x1], 0 }
   0x7   :  { %14 = vsyncpa [#allocation4], 0 }
   0x8   :  { %16 = vsyncpa [#allocation4 + $0x1], 0  ;;  %s1877_s12 = smov 0   ;;  %s1879_s13 = smov 0  }
   0x9   :  { %s1881_s14 = smov 0   ;;  %s1883_s15 = smov 0  }
   0xa   :  { %s1885_s16 = smov 0   ;;  %s1887_s17 = smov 0  }
   0xb LB: > { %2285 = sst [smem:[#allocation12_spill]] %s1840_s16  ;;  %s1908_s18 = sadd.s32 4294967295, %s1844_s17   ;;  %s1844_s17 = sphi %s1887_s17, %s22_s17   ;;  %s1840_s16 = sphi %s1885_s16, %s2299_s16   ;;  %s1836_s15 = sphi %s1883_s15, %s2298_s15   ;;  %s1832_s14 = sphi %s1881_s14, %s2302_s14   ;;  %s1828_s13 = sphi %s1879_s13, %s2301_s13   ;;  %s1824_s12 = sphi %s1877_s12, %s2300_s12  }
   0xc   : > { %s1262_s19 = sadd.s32 4294967294, %s1844_s17   ;;  %s34_s20 = sadd.s32 1, %s1840_s16 }
   0xd   : > { %s43_s21 = sadd.s32 1, %s1832_s14  ;;  %p36_p0 = scmp.ge.s32.totalorder %s34_s20, 2 }
   0xe   : > { %p50_p1 = scmp.ne.s32.totalorder %s1832_s14, %s1828_s13  ;;  %p51_p2 = scmp.eq.s32.totalorder %s1844_s17, 0 }
   0xf   : > { %p56_p3 = scmp.ne.s32.totalorder %s1828_s13, %s1824_s12  ;;  %s2304_s20 = smov (%p36_p0, %s34_s20), 0 }
  0x10   : > { %2286 = sst [smem:[#allocation13_spill]] %s2304_s20  ;;  %p1920_p4 = por %p51_p2, %p50_p1 }
  0x11   : > { %p57_p5 = scmp.eq.s32.totalorder %s1908_s18, 0  ;;  %s38_s23 = ssub.s32 %s1840_s16, %s2304_s20 }
  0x12   : > { %p138_p6 = scmp.eq.s32.totalorder %s1908_s18, 1  ;;  %p41_p7 = scmp.eq.s32.totalorder %s38_s23, 0 }
  0x13   : > { %p1928_p8 = por %p57_p5, %p56_p3  ;;  %p144_p10 = scmp.eq.s32.totalorder %s1262_s19, 1 }
  0x14   : > { %p1932_p9 = por %p138_p6, %p50_p1  ;;  %p1264_p12 = scmp.ge.s32.totalorder %s1844_s17, 2 }
  0x15   : > { %s1937_s26 = scalar_select %p41_p7, %s1832_s14, %s43_s21  }
  0x16   : > { %p1939_p11 = por %p144_p10, %p56_p3  ;;  %p1549_p13 = scmp.lt.s32.totalorder %s1844_s17, 2 }
  0x17   : > { %2290 = sst [smem:[#allocation14_spill]] %s1937_s26  ;;  %s164_s28 = sand.u32 1, %s1832_s14  }
  0x18   : > { %s1948_s29 = sshll.u32 %s164_s28, 5  ;;  %s1951_s30 = smul.u32 1536, %s1840_s16 }
  0x19   : > { %p1955_p0 = pnand %p1549_p13, %p1920_p4  ;;  %s188_s5 = sand.u32 1, %s1844_s17  }
  0x1a   : > { %s2293_s1 = sld [smem:[#allocation16_spill]]  ;;  %s192_s10 = scalar_lea.vmem [#allocation5], %s1948_s29 }
  0x1b   : > { %s203_s11 = sshll.u32 %s192_s10, 4  ;;  %p1271_p1 = scmp.ge.s32.totalorder %s1844_s17, 1  ;;  %s204_s11 = int_to_ptr.vmem [resolvable:$true] %s203_s11 }
  0x1c   : > { %s1966_s19 = scalar_lea.sflag [#allocation6], %s188_s5  ;;  %p1676_p2 = pneg %p1955_p0 }
  0x1d   : > { %s1687_s21 = scalar_lea.vmem %s204_s11, 512  ;;  %s1846_s22 = smov [#allocation5]  }
  0x1e   : > { %p1688_p3 = scmp.ne.s32.totalorder %s204_s11, %s1687_s21  ;;  %s1692_s23 = sshll.u32 %s1846_s22, 4  ;;  %s1693_s23 = int_to_ptr.vmem [resolvable:$false] %s1692_s23 }
  0x1f   : > { %s1694_s6 = scalar_lea.vmem %s1693_s23, 1024  ;;  %p1695_p6 = scmp.lt.s32.totalorder %s204_s11, %s1693_s23 }
  0x20   : > { %s1168_s8 = scalar_lea.hbm %s2293_s1, %s1951_s30  ;;  %p1690_p4 = pnand %p1688_p3, %p1676_p2 }
  0x21   : > { %s1169_s9 = scalar_lea.hbm %s1168_s8, 512  ;;  %p1696_p7 = scmp.lt.s32.totalorder %s1694_s6, %s1687_s21 }
  0x22   : > { %p1691_p5 = pneg %p1690_p4 }
  0x23   : > { %p1697_p10 = por %p1696_p7, %p1695_p6 }
  0x25   : > { %p1698_p13 = pnand %p1697_p10, %p1691_p5 }
  0x27   : > { %1701 = shalt.err (!%p1698_p13)
}
  0x28   : > { %s2280_s7 = smov 128   ;;  %s1848_s5 = smov 8  }
  0x29   : > { %1541 = dma.hbm_to_vmem [thread:$0]  (!%p1955_p0), %s1169_s9, 512, %s204_s11, %s1966_s19, %s2280_s7, %s2280_s7, %s1848_s5  }
  0x2a   : > { %p236_p3 = scmp.lt.s32.totalorder %s1844_s17, 3  ;;  %s2295_s0 = sld [smem:[#allocation15_spill]] }
  0x2b   : > { %s168_s23 = scalar_lea.vmem [#allocation2], %s1948_s29  ;;  %s165_s1 = scalar_lea.sflag [#allocation3], %s164_s28 }
  0x2c   : > { %p1982_p4 = pnand %p1271_p1, %p236_p3  ;;  %s178_s6 = sshll.u32 %s168_s23, 4  ;;  %s179_s6 = int_to_ptr.vmem [resolvable:$true] %s178_s6 }
  0x2d   : > { %s1716_s20 = scalar_lea.vmem %s179_s6, 512  ;;  %s1849_s9 = smov [#allocation2]  }
  0x2e   : > { %p1717_p5 = scmp.ne.s32.totalorder %s179_s6, %s1716_s20  ;;  %s1721_s11 = sshll.u32 %s1849_s9, 4  ;;  %s1722_s11 = int_to_ptr.vmem [resolvable:$false] %s1721_s11 }
  0x2f   : > { %s1723_s7 = scalar_lea.vmem %s1722_s11, 1024  ;;  %p1724_p1 = scmp.lt.s32.totalorder %s179_s6, %s1722_s11 }
  0x30   : > { %s177_s22 = scalar_lea.hbm %s2295_s0, %s1951_s30  ;;  %p1719_p6 = pnand %p1717_p5, %p1676_p2 }
  0x31   : > { %p1725_p10 = scmp.lt.s32.totalorder %s1723_s7, %s1716_s20 }
  0x32   : > { %p1720_p7 = pneg %p1719_p6 }
  0x33   : > { %p1726_p13 = por %p1725_p10, %p1724_p1 }
  0x35   : > { %p1727_p3 = pnand %p1726_p13, %p1720_p7 }
  0x37   : > { %1730 = shalt.err (!%p1727_p3)
}
  0x38   : > { %s2296_s10 = smov 128   ;;  %s1177_s23 = scalar_lea.hbm %s2277_s2, %s1951_s30 }
  0x39   : > { %1538 = dma.hbm_to_vmem [thread:$0]  (!%p1955_p0), %s177_s22, 512, %s179_s6, %s165_s1, %s2296_s10, %s2296_s10, %s1848_s5  }
  0x3a   : > { %s217_s9 = scalar_lea.vmem [#allocation7], %s1948_s29  ;;  %s1178_s11 = scalar_lea.hbm %s1177_s23, 1024 }
  0x3b   : > { %s228_s0 = sshll.u32 %s217_s9, 4  ;;  %s1850_s7 = smov [#allocation7]   ;;  %s229_s0 = int_to_ptr.vmem [resolvable:$true] %s228_s0 }
  0x3c   : > { %s1744_s20 = scalar_lea.vmem %s229_s0, 512  ;;  %s1749_s16 = sshll.u32 %s1850_s7, 4  ;;  %s1750_s16 = int_to_ptr.vmem [resolvable:$false] %s1749_s16 }
  0x3d   : > { %p1745_p5 = scmp.ne.s32.totalorder %s229_s0, %s1744_s20  ;;  %s1751_s26 = scalar_lea.vmem %s1750_s16, 1024 }
  0x3e   : > { %p1752_p1 = scmp.lt.s32.totalorder %s229_s0, %s1750_s16  ;;  %p1753_p10 = scmp.lt.s32.totalorder %s1751_s26, %s1744_s20 }
  0x3f   : > { %p1747_p6 = pnand %p1745_p5, %p1676_p2 }
  0x40   : > { %p1754_p13 = por %p1753_p10, %p1752_p1 }
  0x41   : > { %p1748_p7 = pneg %p1747_p6 }
  0x43   : > { %p1755_p3 = pnand %p1754_p13, %p1748_p7 }
  0x45   : > { %1758 = shalt.err (!%p1755_p3)
}
  0x46   : > { %1544 = dma.hbm_to_vmem [thread:$0]  (!%p1955_p0), %s1178_s11, 512, %s229_s0, %s1966_s19, %s2296_s10, %s2296_s10, %s1848_s5  }
  0x47   : > { %240 = sbr.rel (%p1982_p4) target bundleno = 918 (0x396), region = 32  ;;  %s2018_s1 = sand.u32 (!%p1982_p4), 1, %s1828_s13  }
  0x48   : > { %s2021_s16 = sshll.u32 (!%p1982_p4), %s2018_s1, 5  ;;  %s243_s26 = scalar_lea.sflag (!%p1982_p4), [#allocation3], %s2018_s1 }
  0x49   : > { %s246_s29 = scalar_lea.vmem (!%p1982_p4), [#allocation2], %s2021_s16 }
  0x4c   : > { %1811 = dma.done.wait (%p1928_p8), %s243_s26, 512  }
  0x4d   : > { %1813 = vsyncadd (%p1928_p8), %s243_s26, 4294966784  ;;  %s251_s0 = sand.u32 1, %s1908_s18   ;;  %s255_s4 = scalar_lea.vmem [#allocation5], %s2021_s16 }
  0x4e   : > { %s252_s30 = scalar_lea.sflag [#allocation6], %s251_s0 }
  0x4f   : > { %1815 = dma.done.wait (%p1928_p8), %s252_s30, 1024  }
  0x50   : > { %1817 = vsyncadd (%p1928_p8), %s252_s30, 4294966272  ;;  %v303_v0 = vld [vmem:[%s246_s29 + $0x10] sm:$0xff]  ;;  %v301_v1 = vld [vmem:[%s246_s29] sm:$0xff]  ;;  %vm349_vm0 = vcmask 130048   ;;  %vm1852_vm1 = vmmov 0   ;;  %s264_s18 = scalar_lea.vmem [#allocation7], %s2021_s16 }
  0x51   : > { %v304_v2 = vld [vmem:[%s246_s29 + $0x18] sm:$0xff]  ;;  %v315_v3 = vmul.f32 0.25, %v303_v0  ;;  %v313_v4 = vmul.f32 0.25, %v301_v1  ;;  %v302_v5 = vld [vmem:[%s246_s29 + $0x8] sm:$0xff]  ;;  %v305_v8 = vld [vmem:[%s255_s4] sm:$0xff]  ;;  %s1313_s24 = sshll.u32 %s1836_s15, 9 }
  0x52   : > { %v306_v6 = vld [vmem:[%s255_s4 + $0x8] sm:$0xff]  ;;  %v308_v7 = vld [vmem:[%s255_s4 + $0x18] sm:$0xff]  ;;  %v307_v9 = vld [vmem:[%s255_s4 + $0x10] sm:$0xff]  ;;  %v316_v10 = vmul.f32 0.25, %v304_v2  ;;  %v314_v11 = vmul.f32 0.25, %v302_v5  ;;  %s296_s19 = scalar_lea.vmem [#allocation8], %s2021_s16  ;;  %s2225_s6 = scalar_lea.hbm %s2278_s3, %s1313_s24 }
  0x53   : > { %1388 = vmatprep.subr.mxu0 %v306_v6  ;;  %1416 = vmatprep.subr.mxu1 %v308_v7  ;;  %s1123_s5 = sshll.u32 %s296_s19, 4  ;;  %s1107_s15 = scalar_lea.sflag [#allocation4], %s2018_s1  ;;  %s2227_s5 = int_to_ptr.vmem [resolvable:$true] %s1123_s5 }
  0x54   : > { %543 = vxpose.xlu1.b32.start [1/2] (short) %v315_v3, 128  ;;  %317 = vxpose.xlu0.b32.start [1/2] (short) %v313_v4, 128  ;;  %s1760_s10 = scalar_lea.vmem %s2227_s5, 512  ;;  %s1854_s28 = smov [#allocation8]  }
  0x55   : > { %1389 = vmatpush3.msra.mxu0 %v306_v6  ;;  %1417 = vmatpush3.msra.mxu1 %v308_v7  ;;  %p1761_p8 = scmp.ne.s32.totalorder %s2227_s5, %s1760_s10  ;;  %s1764_s21 = sshll.u32 %s1854_s28, 4  ;;  %s1765_s21 = int_to_ptr.vmem [resolvable:$false] %s1764_s21 }
  0x56   : > { %1390 = vmatprep.subr.mxu0 %v305_v8  ;;  %1418 = vmatprep.subr.mxu1 %v307_v9  ;;  %s1766_s23 = scalar_lea.vmem %s1765_s21, 1024  ;;  %p1767_p4 = scmp.lt.s32.totalorder %s2227_s5, %s1765_s21 }
  0x57   : > { %1391 = vmatpush3.msra.mxu0 %v305_v8  ;;  %1419 = vmatpush3.msra.mxu1 %v307_v9  ;;  %p1762_p0 = pnand %p1761_p8, %p1932_p9  ;;  %p1768_p5 = scmp.lt.s32.totalorder %s1766_s23, %s1760_s10 }
  0x58   : > { %544 = vxpose.xlu1.b32.end [2/2] (short) %v316_v10, 128  ;;  %318 = vxpose.xlu0.b32.end [2/2] (short) %v314_v11, 128 }
  0x59   : > { %p1763_p2 = pneg %p1762_p0  ;;  %p1769_p6 = por %p1768_p5, %p1767_p4 }
  0x5b   : > { %p1770_p7 = pnand %p1769_p6, %p1763_p2 }
  0xd0   : > { %v559_v12 = vpop.trf.xlu1  ;;  %v333_v13 = vpop.trf.xlu0 }
  0xd1   : > { %1420 = vmatprep.mubr.msk.f32.mxu1 %vm349_vm0, %v559_v12  ;;  %1392 = vmatprep.mubr.msk.f32.mxu0 %vm349_vm0, %v333_v13  ;;  %v1851_v12 = vmov 0.0  }
  0xd2   : > { %1444 = vmatprep.subr.mxu0 %v1851_v12  ;;  %1485 = vmatprep.subr.mxu1 %v1851_v12 }
  0xd4   : > { %v560_v14 = vpop.trf.xlu1  ;;  %v334_v15 = vpop.trf.xlu0 }
  0xd5   : > { %1393 = vmatmul.mubr.msk.f32.vlgmr.msra.gmra.mxu0 %vm349_vm0, %v334_v15  ;;  %1421 = vmatmul.mubr.msk.f32.vlgmr.msra.gmra.mxu1 %vm349_vm0, %v560_v14 }
  0xd8   : > { %v561_v16 = vpop.trf.xlu1  ;;  %v335_v17 = vpop.trf.xlu0 }
  0xd9   : > { %1423 = vmatprep.mubr.msk.f32.mxu1 %vm349_vm0, %v561_v16  ;;  %1395 = vmatprep.mubr.msk.f32.mxu0 %vm349_vm0, %v335_v17 }
  0xdc   : > { %v562_v18 = vpop.trf.xlu1  ;;  %v336_v19 = vpop.trf.xlu0 }
  0xdd   : > { %1396 = vmatmul.mubr.msk.f32.gmra.mxu0 %vm349_vm0, %v336_v19  ;;  %1424 = vmatmul.mubr.msk.f32.gmra.mxu1 %vm349_vm0, %v562_v18 }
  0xe0   : > { %v563_v20 = vpop.trf.xlu1  ;;  %v337_v21 = vpop.trf.xlu0 }
  0xe1   : > { %1426 = vmatprep.mubr.msk.f32.mxu1 %vm349_vm0, %v563_v20  ;;  %1398 = vmatprep.mubr.msk.f32.mxu0 %vm349_vm0, %v337_v21 }
  0xe4   : > { %v564_v22 = vpop.trf.xlu1  ;;  %v338_v23 = vpop.trf.xlu0 }
  0xe5   : > { %1399 = vmatmul.mubr.msk.f32.gmra.mxu0 %vm349_vm0, %v338_v23  ;;  %1427 = vmatmul.mubr.msk.f32.gmra.mxu1 %vm349_vm0, %v564_v22 }
  0xe8   : > { %v565_v24 = vpop.trf.xlu1  ;;  %v339_v25 = vpop.trf.xlu0 }
  0xe9   : > { %1429 = vmatprep.mubr.msk.f32.mxu1 %vm349_vm0, %v565_v24  ;;  %1401 = vmatprep.mubr.msk.f32.mxu0 %vm349_vm0, %v339_v25 }
  0xec   : > { %v566_v26 = vpop.trf.xlu1  ;;  %v340_v27 = vpop.trf.xlu0 }
  0xed   : > { %1402 = vmatmul.mubr.msk.f32.gmra.mxu0 %vm349_vm0, %v340_v27  ;;  %1430 = vmatmul.mubr.msk.f32.gmra.mxu1 %vm349_vm0, %v566_v26 }
  0xf0   : > { %v567_v28 = vpop.trf.xlu1  ;;  %v341_v29 = vpop.trf.xlu0 }
  0xf1   : > { %1432 = vmatprep.mubr.msk.f32.mxu1 %vm349_vm0, %v567_v28  ;;  %1404 = vmatprep.mubr.msk.f32.mxu0 %vm349_vm0, %v341_v29 }
  0xf4   : > { %v568_v30 = vpop.trf.xlu1  ;;  %v342_v31 = vpop.trf.xlu0 }
  0xf5   : > { %1405 = vmatmul.mubr.msk.f32.gmra.mxu0 %vm349_vm0, %v342_v31  ;;  %1433 = vmatmul.mubr.msk.f32.gmra.mxu1 %vm349_vm0, %v568_v30 }
  0xf8   : > { %v569_v32 = vpop.trf.xlu1  ;;  %v343_v33 = vpop.trf.xlu0 }
  0xf9   : > { %1435 = vmatprep.mubr.msk.f32.mxu1 %vm349_vm0, %v569_v32  ;;  %1407 = vmatprep.mubr.msk.f32.mxu0 %vm349_vm0, %v343_v33 }
  0xfc   : > { %v570_v34 = vpop.trf.xlu1  ;;  %v344_v35 = vpop.trf.xlu0 }
  0xfd   : > { %1408 = vmatmul.mubr.msk.f32.gmra.mxu0 %vm349_vm0, %v344_v35  ;;  %1436 = vmatmul.mubr.msk.f32.gmra.mxu1 %vm349_vm0, %v570_v34 }
 0x100   : > { %v571_v36 = vpop.trf.xlu1  ;;  %v345_v37 = vpop.trf.xlu0 }
 0x101   : > { %1438 = vmatprep.mubr.msk.f32.mxu1 %vm349_vm0, %v571_v36  ;;  %1410 = vmatprep.mubr.msk.f32.mxu0 %vm349_vm0, %v345_v37 }
 0x104   : > { %v572_v38 = vpop.trf.xlu1  ;;  %v346_v39 = vpop.trf.xlu0 }
 0x105   : > { %1411 = vmatmul.mubr.msk.f32.gmra.mxu0 %vm349_vm0, %v346_v39  ;;  %1439 = vmatmul.mubr.msk.f32.gmra.mxu1 %vm349_vm0, %v572_v38 }
 0x108   : > { %v573_v40 = vpop.trf.xlu1  ;;  %v347_v41 = vpop.trf.xlu0 }
 0x109   : > { %1441 = vmatprep.mubr.msk.f32.mxu1 %vm349_vm0, %v573_v40  ;;  %1413 = vmatprep.mubr.msk.f32.mxu0 %vm349_vm0, %v347_v41 }
 0x10c   : > { %v574_v42 = vpop.trf.xlu1  ;;  %v348_v43 = vpop.trf.xlu0 }
 0x10d   : > { %1414 = vmatmul.mubr.msk.f32.gmra.mxu0 %vm349_vm0, %v348_v43  ;;  %1442 = vmatmul.mubr.msk.f32.gmra.mxu1 %vm349_vm0, %v574_v42 }
 0x10e   : > { %1476 = vmatprep.mubr.msk.f32.mxu0 %vm1852_vm1, %v1851_v12  ;;  %1517 = vmatprep.mubr.msk.f32.mxu1 %vm1852_vm1, %v1851_v12 }
 0x195   : > { %v2067_v44 = vpop.f32.mrf.mxu0  ;;  %v2069_v45 = vpop.f32.mrf.mxu1 }
 0x197   : > { %v2071_v46 = vpop.f32.mrf.mxu0  ;;  %v2073_v47 = vpop.f32.mrf.mxu1 }
 0x19d   : > { %v2075_v48 = vpop.f32.mrf.mxu0  ;;  %v2077_v49 = vpop.f32.mrf.mxu1 }
 0x19f   : > { %v2079_v50 = vpop.f32.mrf.mxu0  ;;  %v2081_v51 = vpop.f32.mrf.mxu1 }
 0x1a5   : > { %v2083_v52 = vpop.f32.mrf.mxu0  ;;  %v2085_v53 = vpop.f32.mrf.mxu1 }
 0x1a7   : > { %v2087_v54 = vpop.f32.mrf.mxu0  ;;  %v2089_v55 = vpop.f32.mrf.mxu1 }
 0x1ad   : > { %v2091_v56 = vpop.f32.mrf.mxu0  ;;  %v2093_v57 = vpop.f32.mrf.mxu1 }
 0x1af   : > { %v2095_v58 = vpop.f32.mrf.mxu0  ;;  %v2097_v59 = vpop.f32.mrf.mxu1 }
 0x1b5   : > { %v2099_v60 = vpop.f32.mrf.mxu0  ;;  %v2101_v61 = vpop.f32.mrf.mxu1 }
 0x1b7   : > { %v2103_v62 = vpop.f32.mrf.mxu0  ;;  %v2105_v63 = vpop.f32.mrf.mxu1 }
 0x1bd   : > { %v2107_v0 = vpop.f32.mrf.mxu0  ;;  %v2109_v1 = vpop.f32.mrf.mxu1 }
 0x1bf   : > { %v2111_v2 = vpop.f32.mrf.mxu0  ;;  %v2113_v3 = vpop.f32.mrf.mxu1 }
 0x1c5   : > { %v1412_v4 = vpop.f32.mrf.mxu0  ;;  %v2115_v5 = vpop.f32.mrf.mxu1 }
 0x1c7   : > { %v2117_v6 = vpop.f32.mrf.mxu0  ;;  %v2119_v7 = vpop.f32.mrf.mxu1 }
 0x1cd   : > { %v1415_v8 = vpop.f32.mrf.mxu0  ;;  %v1443_v9 = vpop.f32.mrf.mxu1 }
 0x1ce   : > { %830 = vmax.xlane.f32.xlu1 %v1443_v9  ;;  %798 = vmax.xlane.f32.xlu0 %v1415_v8 }
 0x1cf   : > { %v534_v10 = vpop.f32.mrf.mxu0  ;;  %v759_v11 = vpop.f32.mrf.mxu1 }
 0x1d2   : > { %794 = vmax.xlane.f32.xlu0 %v1412_v4  ;;  %796 = vmax.xlane.f32.xlu1 %v534_v10 }
 0x1d6   : > { %792 = vmax.xlane.f32.xlu0 %v2117_v6  ;;  %828 = vmax.xlane.f32.xlu1 %v759_v11 }
 0x1da   : > { %790 = vmax.xlane.f32.xlu0 %v2107_v0  ;;  %826 = vmax.xlane.f32.xlu1 %v2115_v5 }
 0x1de   : > { %788 = vmax.xlane.f32.xlu0 %v2111_v2  ;;  %824 = vmax.xlane.f32.xlu1 %v2119_v7 }
 0x1e2   : > { %786 = vmax.xlane.f32.xlu0 %v2099_v60  ;;  %822 = vmax.xlane.f32.xlu1 %v2109_v1 }
 0x1e6   : > { %784 = vmax.xlane.f32.xlu0 %v2103_v62  ;;  %820 = vmax.xlane.f32.xlu1 %v2113_v3 }
 0x1ea   : > { %782 = vmax.xlane.f32.xlu0 %v2091_v56  ;;  %818 = vmax.xlane.f32.xlu1 %v2101_v61 }
 0x1ee   : > { %780 = vmax.xlane.f32.xlu0 %v2095_v58  ;;  %816 = vmax.xlane.f32.xlu1 %v2105_v63 }
 0x1f2   : > { %778 = vmax.xlane.f32.xlu0 %v2083_v52  ;;  %814 = vmax.xlane.f32.xlu1 %v2093_v57 }
 0x1f6   : > { %776 = vmax.xlane.f32.xlu0 %v2087_v54  ;;  %812 = vmax.xlane.f32.xlu1 %v2097_v59 }
 0x1fa   : > { %774 = vmax.xlane.f32.xlu0 %v2075_v48  ;;  %810 = vmax.xlane.f32.xlu1 %v2085_v53 }
 0x1fe   : > { %772 = vmax.xlane.f32.xlu0 %v2079_v50  ;;  %808 = vmax.xlane.f32.xlu1 %v2089_v55 }
 0x202   : > { %770 = vmax.xlane.f32.xlu0 %v2067_v44  ;;  %806 = vmax.xlane.f32.xlu1 %v2077_v49 }
 0x206   : > { %768 = vmax.xlane.f32.xlu0 %v2071_v46  ;;  %804 = vmax.xlane.f32.xlu1 %v2081_v51 }
 0x20a   : > { %802 = vmax.xlane.f32.xlu1 %v2069_v45 }
 0x20e   : > { %800 = vmax.xlane.f32.xlu1 %v2073_v47 }
 0x257   : > { %v831_v13 = vpop.xlane.xlu1 %830  ;;  %v799_v14 = vpop.xlane.xlu0 %798 }
 0x258   : > { %v863_v15 = vsub.f32 %v1443_v9, %v831_v13  ;;  %v847_v16 = vsub.f32 %v1415_v8, %v799_v14 }
 0x25a   : > { %v926_v17 = vmul.f32 1.442695, %v863_v15  ;;  %v894_v18 = vmul.f32 1.442695, %v847_v16 }
 0x25b   : > { %v795_v19 = vpop.xlane.xlu0 %794  ;;  %v797_v20 = vpop.xlane.xlu1 %796 }
 0x25c   : > { %1606 = vpow2.f32 %v926_v17  ;;  %v845_v21 = vsub.f32 %v1412_v4, %v795_v19  ;;  %v846_v22 = vsub.f32 %v534_v10, %v797_v20 }
 0x25d   : > { %1608 = vpow2.f32 %v894_v18 }
 0x25e   : > { %v892_v23 = vmul.f32 1.442695, %v846_v22  ;;  %v890_v26 = vmul.f32 1.442695, %v845_v21 }
 0x25f   : > { %v793_v24 = vpop.xlane.xlu0 %792  ;;  %v829_v25 = vpop.xlane.xlu1 %828 }
 0x260   : > { %v844_v27 = vsub.f32 %v2117_v6, %v793_v24  ;;  %v862_v28 = vsub.f32 %v759_v11, %v829_v25  ;;  %1610 = vpow2.f32 %v892_v23 }
 0x261   : > { %1612 = vpow2.f32 %v890_v26 }
 0x262   : > { %v924_v29 = vmul.f32 1.442695, %v862_v28  ;;  %v888_v32 = vmul.f32 1.442695, %v844_v27 }
 0x263   : > { %v791_v30 = vpop.xlane.xlu0 %790  ;;  %v827_v31 = vpop.xlane.xlu1 %826 }
 0x264   : > { %v843_v33 = vsub.f32 %v2107_v0, %v791_v30  ;;  %v861_v34 = vsub.f32 %v2115_v5, %v827_v31  ;;  %1614 = vpow2.f32 %v924_v29 }
 0x265   : > { %1616 = vpow2.f32 %v888_v32 }
 0x266   : > { %v922_v35 = vmul.f32 1.442695, %v861_v34  ;;  %v886_v38 = vmul.f32 1.442695, %v843_v33 }
 0x267   : > { %v789_v36 = vpop.xlane.xlu0 %788  ;;  %v825_v37 = vpop.xlane.xlu1 %824 }
 0x268   : > { %v842_v39 = vsub.f32 %v2111_v2, %v789_v36  ;;  %v860_v40 = vsub.f32 %v2119_v7, %v825_v37  ;;  %1618 = vpow2.f32 %v922_v35 }
 0x269   : > { %v1607_v41 = vpop.eup %1606  ;;  %1620 = vpow2.f32 %v886_v38 }
 0x26a   : > { %v1609_v42 = vpop.eup %1608  ;;  %v920_v43 = vmul.f32 1.442695, %v860_v40  ;;  %1486 = vmatpush3.xpose.msra.mxu1 %v1607_v41  ;;  %v884_v5 = vmul.f32 1.442695, %v842_v39 }
 0x26b   : > { %1445 = vmatpush3.xpose.msra.mxu0 %v1609_v42  ;;  %v787_v4 = vpop.xlane.xlu0 %786  ;;  %v823_v0 = vpop.xlane.xlu1 %822  ;;  %1487 = vmatprep.subr.mxu1 %v1851_v12 }
 0x26c   : > { %v841_v6 = vsub.f32 %v2099_v60, %v787_v4  ;;  %v859_v8 = vsub.f32 %v2109_v1, %v823_v0  ;;  %1446 = vmatprep.subr.mxu0 %v1851_v12  ;;  %1622 = vpow2.f32 %v920_v43 }
 0x26d   : > { %v1611_v2 = vpop.eup %1610  ;;  %1624 = vpow2.f32 %v884_v5 }
 0x26e   : > { %v918_v7 = vmul.f32 1.442695, %v859_v8  ;;  %v882_v11 = vmul.f32 1.442695, %v841_v6  ;;  %v1613_v15 = vpop.eup %1612 }
 0x26f   : > { %1447 = vmatpush3.xpose.msra.mxu0 %v1611_v2  ;;  %v785_v9 = vpop.xlane.xlu0 %784  ;;  %v821_v10 = vpop.xlane.xlu1 %820 }
 0x270   : > { %v840_v13 = vsub.f32 %v2103_v62, %v785_v9  ;;  %v858_v14 = vsub.f32 %v2113_v3, %v821_v10  ;;  %1448 = vmatprep.subr.mxu0 %v1851_v12  ;;  %1626 = vpow2.f32 %v918_v7 }
 0x271   : > { %v1615_v60 = vpop.eup %1614  ;;  %1628 = vpow2.f32 %v882_v11 }
 0x272   : > { %v916_v1 = vmul.f32 1.442695, %v858_v14  ;;  %1488 = vmatpush3.xpose.msra.mxu1 %v1615_v60  ;;  %v880_v18 = vmul.f32 1.442695, %v840_v13  ;;  %v1617_v62 = vpop.eup %1616 }
 0x273   : > { %1449 = vmatpush3.xpose.msra.mxu0 %v1613_v15  ;;  %v783_v16 = vpop.xlane.xlu0 %782  ;;  %v819_v17 = vpop.xlane.xlu1 %818  ;;  %1489 = vmatprep.subr.mxu1 %v1851_v12 }
 0x274   : > { %v839_v19 = vsub.f32 %v2091_v56, %v783_v16  ;;  %v857_v20 = vsub.f32 %v2101_v61, %v819_v17  ;;  %1450 = vmatprep.subr.mxu0 %v1851_v12  ;;  %1630 = vpow2.f32 %v916_v1 }
 0x275   : > { %v1619_v3 = vpop.eup %1618  ;;  %1632 = vpow2.f32 %v880_v18 }
 0x276   : > { %v914_v21 = vmul.f32 1.442695, %v857_v20  ;;  %1490 = vmatpush3.xpose.msra.mxu1 %v1619_v3  ;;  %v878_v24 = vmul.f32 1.442695, %v839_v19  ;;  %v1621_v61 = vpop.eup %1620 }
 0x277   : > { %1451 = vmatpush3.xpose.msra.mxu0 %v1617_v62  ;;  %v781_v22 = vpop.xlane.xlu0 %780  ;;  %v817_v23 = vpop.xlane.xlu1 %816  ;;  %1491 = vmatprep.subr.mxu1 %v1851_v12 }
 0x278   : > { %v838_v25 = vsub.f32 %v2095_v58, %v781_v22  ;;  %v856_v56 = vsub.f32 %v2105_v63, %v817_v23  ;;  %1452 = vmatprep.subr.mxu0 %v1851_v12  ;;  %1634 = vpow2.f32 %v914_v21 }
 0x279   : > { %v1623_v26 = vpop.eup %1622  ;;  %1636 = vpow2.f32 %v878_v24 }
 0x27a   : > { %v912_v27 = vmul.f32 1.442695, %v856_v56  ;;  %1492 = vmatpush3.xpose.msra.mxu1 %v1623_v26  ;;  %v876_v30 = vmul.f32 1.442695, %v838_v25  ;;  %v1625_v63 = vpop.eup %1624 }
 0x27b   : > { %1453 = vmatpush3.xpose.msra.mxu0 %v1621_v61  ;;  %v779_v28 = vpop.xlane.xlu0 %778  ;;  %v815_v29 = vpop.xlane.xlu1 %814  ;;  %1493 = vmatprep.subr.mxu1 %v1851_v12 }
 0x27c   : > { %v837_v31 = vsub.f32 %v2083_v52, %v779_v28  ;;  %v855_v58 = vsub.f32 %v2093_v57, %v815_v29  ;;  %1454 = vmatprep.subr.mxu0 %v1851_v12  ;;  %1638 = vpow2.f32 %v912_v27 }
 0x27d   : > { %v1627_v32 = vpop.eup %1626  ;;  %1640 = vpow2.f32 %v876_v30  ;;  %v309_v30 = vld [vmem:[%s264_s18] sm:$0xff] }
 0x27e   : > { %v910_v33 = vmul.f32 1.442695, %v855_v58  ;;  %1494 = vmatpush3.xpose.msra.mxu1 %v1627_v32  ;;  %v874_v36 = vmul.f32 1.442695, %v837_v31  ;;  %v1629_v57 = vpop.eup %1628  ;;  %v310_v58 = vld [vmem:[%s264_s18 + $0x8] sm:$0xff]  ;;  %v312_v32 = vld [vmem:[%s264_s18 + $0x18] sm:$0xff] }
 0x27f   : > { %1455 = vmatpush3.xpose.msra.mxu0 %v1625_v63  ;;  %v777_v34 = vpop.xlane.xlu0 %776  ;;  %v813_v35 = vpop.xlane.xlu1 %812  ;;  %1495 = vmatprep.subr.mxu1 %v1851_v12  ;;  %v311_v63 = vld [vmem:[%s264_s18 + $0x10] sm:$0xff] }
 0x280   : > { %v836_v37 = vsub.f32 %v2087_v54, %v777_v34  ;;  %v854_v52 = vsub.f32 %v2097_v59, %v813_v35  ;;  %1456 = vmatprep.subr.mxu0 %v1851_v12  ;;  %1642 = vpow2.f32 %v910_v33  ;;  %v1853_v33 = vmov 1.0  }
 0x281   : > { %v1631_v38 = vpop.eup %1630  ;;  %1644 = vpow2.f32 %v874_v36 }
 0x282   : > { %v908_v39 = vmul.f32 1.442695, %v854_v52  ;;  %1496 = vmatpush3.xpose.msra.mxu1 %v1631_v38  ;;  %v872_v42 = vmul.f32 1.442695, %v836_v37  ;;  %v1633_v59 = vpop.eup %1632 }
 0x283   : > { %1457 = vmatpush3.xpose.msra.mxu0 %v1629_v57  ;;  %v775_v40 = vpop.xlane.xlu0 %774  ;;  %v811_v41 = vpop.xlane.xlu1 %810  ;;  %1497 = vmatprep.subr.mxu1 %v1851_v12 }
 0x284   : > { %v835_v43 = vsub.f32 %v2075_v48, %v775_v40  ;;  %v853_v54 = vsub.f32 %v2085_v53, %v811_v41  ;;  %1458 = vmatprep.subr.mxu0 %v1851_v12  ;;  %1646 = vpow2.f32 %v908_v39 }
 0x285   : > { %v1635_v4 = vpop.eup %1634  ;;  %1648 = vpow2.f32 %v872_v42  ;;  %v1090_v42 = vlaneseq }
 0x286   : > { %v906_v0 = vmul.f32 1.442695, %v853_v54  ;;  %1498 = vmatpush3.xpose.msra.mxu1 %v1635_v4  ;;  %v870_v8 = vmul.f32 1.442695, %v835_v43  ;;  %v1637_v53 = vpop.eup %1636 }
 0x287   : > { %1459 = vmatpush3.xpose.msra.mxu0 %v1633_v59  ;;  %v773_v5 = vpop.xlane.xlu0 %772  ;;  %v809_v6 = vpop.xlane.xlu1 %808  ;;  %1499 = vmatprep.subr.mxu1 %v1851_v12  ;;  %v1091_v59 = vshrl.u32 %v1090_v42, 7 }
 0x288   : > { %v834_v2 = vsub.f32 %v2079_v50, %v773_v5  ;;  %v852_v48 = vsub.f32 %v2089_v55, %v809_v6  ;;  %1460 = vmatprep.subr.mxu0 %v1851_v12  ;;  %1650 = vpow2.f32 %v906_v0 }
 0x289   : > { %v1639_v7 = vpop.eup %1638  ;;  %1652 = vpow2.f32 %v870_v8 }
 0x28a   : > { %v904_v9 = vmul.f32 1.442695, %v852_v48  ;;  %1500 = vmatpush3.xpose.msra.mxu1 %v1639_v7  ;;  %v868_v13 = vmul.f32 1.442695, %v834_v2  ;;  %v1641_v55 = vpop.eup %1640 }
 0x28b   : > { %1461 = vmatpush3.xpose.msra.mxu0 %v1637_v53  ;;  %v771_v10 = vpop.xlane.xlu0 %770  ;;  %v807_v11 = vpop.xlane.xlu1 %806  ;;  %1501 = vmatprep.subr.mxu1 %v1851_v12 }
 0x28c   : > { %v833_v14 = vsub.f32 %v2067_v44, %v771_v10  ;;  %v851_v50 = vsub.f32 %v2077_v49, %v807_v11  ;;  %1462 = vmatprep.subr.mxu0 %v1851_v12  ;;  %1654 = vpow2.f32 %v904_v9 }
 0x28d   : > { %v1643_v15 = vpop.eup %1642  ;;  %1656 = vpow2.f32 %v868_v13 }
 0x28e   : > { %v902_v60 = vmul.f32 1.442695, %v851_v50  ;;  %1502 = vmatpush3.xpose.msra.mxu1 %v1643_v15  ;;  %v866_v17 = vmul.f32 1.442695, %v833_v14  ;;  %v1645_v44 = vpop.eup %1644 }
 0x28f   : > { %1463 = vmatpush3.xpose.msra.mxu0 %v1641_v55  ;;  %v769_v1 = vpop.xlane.xlu0 %768  ;;  %v805_v16 = vpop.xlane.xlu1 %804  ;;  %1503 = vmatprep.subr.mxu1 %v1851_v12 }
 0x290   : > { %v850_v18 = vsub.f32 %v2081_v51, %v805_v16  ;;  %1464 = vmatprep.subr.mxu0 %v1851_v12  ;;  %1658 = vpow2.f32 %v902_v60  ;;  %v832_v49 = vsub.f32 %v2071_v46, %v769_v1 }
 0x291   : > { %v1647_v19 = vpop.eup %1646  ;;  %1660 = vpow2.f32 %v866_v17 }
 0x292   : > { %v900_v20 = vmul.f32 1.442695, %v850_v18  ;;  %1504 = vmatpush3.xpose.msra.mxu1 %v1647_v19  ;;  %v1649_v51 = vpop.eup %1648  ;;  %v864_v21 = vmul.f32 1.442695, %v832_v49 }
 0x293   : > { %1465 = vmatpush3.xpose.msra.mxu0 %v1645_v44  ;;  %v803_v62 = vpop.xlane.xlu1 %802  ;;  %1505 = vmatprep.subr.mxu1 %v1851_v12 }
 0x294   : > { %v849_v3 = vsub.f32 %v2069_v45, %v803_v62  ;;  %1466 = vmatprep.subr.mxu0 %v1851_v12  ;;  %1662 = vpow2.f32 %v900_v20 }
 0x295   : > { %v1651_v22 = vpop.eup %1650 }
 0x296   : > { %v898_v23 = vmul.f32 1.442695, %v849_v3  ;;  %1506 = vmatpush3.xpose.msra.mxu1 %v1651_v22  ;;  %v1653_v45 = vpop.eup %1652 }
 0x297   : > { %1467 = vmatpush3.xpose.msra.mxu0 %v1649_v51  ;;  %v801_v46 = vpop.xlane.xlu1 %800  ;;  %1507 = vmatprep.subr.mxu1 %v1851_v12 }
 0x298   : > { %1664 = vpow2.f32 %v898_v23  ;;  %v848_v24 = vsub.f32 %v2073_v47, %v801_v46  ;;  %1468 = vmatprep.subr.mxu0 %v1851_v12 }
 0x299   : > { %1666 = vpow2.f32 %v864_v21  ;;  %v1655_v25 = vpop.eup %1654 }
 0x29a   : > { %v896_v56 = vmul.f32 1.442695, %v848_v24  ;;  %1508 = vmatpush3.xpose.msra.mxu1 %v1655_v25  ;;  %v1657_v61 = vpop.eup %1656 }
 0x29b   : > { %1469 = vmatpush3.xpose.msra.mxu0 %v1653_v45  ;;  %1509 = vmatprep.subr.mxu1 %v1851_v12 }
 0x29c   : > { %1668 = vpow2.f32 %v896_v56  ;;  %1470 = vmatprep.subr.mxu0 %v1851_v12 }
 0x29d   : > { %v1659_v26 = vpop.eup %1658 }
 0x29e   : > { %1510 = vmatpush3.xpose.msra.mxu1 %v1659_v26  ;;  %v1661_v47 = vpop.eup %1660 }
 0x29f   : > { %1471 = vmatpush3.xpose.msra.mxu0 %v1657_v61  ;;  %1511 = vmatprep.subr.mxu1 %v1851_v12 }
 0x2a0   : > { %1472 = vmatprep.subr.mxu0 %v1851_v12 }
 0x2a1   : > { %v1663_v27 = vpop.eup %1662 }
 0x2a2   : > { %1512 = vmatpush3.xpose.msra.mxu1 %v1663_v27 }
 0x2a3   : > { %1473 = vmatpush3.xpose.msra.mxu0 %v1661_v47  ;;  %1513 = vmatprep.subr.mxu1 %v1851_v12 }
 0x2a4   : > { %1474 = vmatprep.subr.mxu0 %v1851_v12 }
 0x2a5   : > { %v1665_v28 = vpop.eup %1664 }
 0x2a6   : > { %v1667_v29 = vpop.eup %1666  ;;  %1514 = vmatpush3.xpose.msra.mxu1 %v1665_v28 }
 0x2a7   : > { %1475 = vmatpush3.xpose.msra.mxu0 %v1667_v29  ;;  %1515 = vmatprep.subr.mxu1 %v1851_v12 }
 0x2a9   : > { %v1669_v31 = vpop.eup %1668 }
 0x2aa   : > { %1477 = vmatmul.mubr.f32.vlgmr.msra.gmra.mxu0 %v309_v30  ;;  %1516 = vmatpush3.xpose.msra.mxu1 %v1669_v31 }
 0x2ab   : > { %1479 = vmatprep.mubr.msk.f32.mxu0 %vm1852_vm1, %v1851_v12 }
 0x2ad   : > { %1518 = vmatmul.mubr.f32.vlgmr.msra.gmra.mxu1 %v311_v63 }
 0x2ae   : > { %1480 = vmatmul.mubr.f32.gmra.mxu0 %v310_v58  ;;  %1520 = vmatprep.mubr.msk.f32.mxu1 %vm1852_vm1, %v1851_v12 }
 0x2af   : > { %1482 = vmatprep.mubr.msk.f32.mxu0 %vm1852_vm1, %v1851_v12 }
 0x2b1   : > { %1521 = vmatmul.mubr.f32.gmra.mxu1 %v312_v32 }
 0x2b2   : > { %1483 = vmatmul.mubr.f32.gmra.mxu0 %v1853_v33  ;;  %1523 = vmatprep.mubr.msk.f32.mxu1 %vm1852_vm1, %v1851_v12  ;;  %v1092_v12 = vsub.s32 0, %v1091_v59 }
 0x2b5   : > { %1524 = vmatmul.mubr.f32.gmra.mxu1 %v1853_v33 }
 0x36a   : > { %v994_v34 = vpop.f32.mrf.mxu0 }
 0x36c   : > { %v1478_v35 = vpop.f32.mrf.mxu0 }
 0x36d   : > { %v1074_v37 = vpop.f32.mrf.mxu1 }
 0x36e   : > { %v999_v36 = vpop.f32.mrf.mxu0 }
 0x36f   : > { %v1519_v57 = vpop.f32.mrf.mxu1 }
 0x370   : > { %v1481_v52 = vpop.f32.mrf.mxu0 }
 0x371   : > { %v1079_v39 = vpop.f32.mrf.mxu1 }
 0x372   : > { %v1004_v38 = vpop.f32.mrf.mxu0 }
 0x373   : > { %1670 = vrcp.f32 %v1004_v38  ;;  %v1522_v40 = vpop.f32.mrf.mxu1 }
 0x374   : > { %v1484_v41 = vpop.f32.mrf.mxu0 }
 0x375   : > { %v1084_v43 = vpop.f32.mrf.mxu1 }
 0x376   : > { %1672 = vrcp.f32 %v1084_v43 }
 0x377   : > { %v1525_v54 = vpop.f32.mrf.mxu1 }
 0x380   : > { %v1671_v4 = vpop.eup %1670 }
 0x381   : > { %v1093_v0 = vrot.slane %v1671_v4, %v1092_v12 }
 0x383   : > { %v1098_v5 = vmul.f32 %v1093_v0, %v994_v34  ;;  %v1099_v6 = vmul.f32 %v1093_v0, %v999_v36  ;;  %v1673_v8 = vpop.eup %1672 }
 0x384   : > { %v1097_v2 = vrot.slane %v1673_v8, %v1092_v12 }
 0x385   : > { %1102 = vst [vmem:[%s296_s19] sm:$0xff] %v1098_v5  ;;  %1103 = vst [vmem:[%s296_s19 + $0x8] sm:$0xff] %v1099_v6 }
 0x386   : > { %v1100_v48 = vmul.f32 %v1097_v2, %v1074_v37  ;;  %v1101_v53 = vmul.f32 %v1097_v2, %v1079_v39 }
 0x388   : > { %1104 = vst [vmem:[%s296_s19 + $0x10] sm:$0xff] %v1100_v48  ;;  %1105 = vst [vmem:[%s296_s19 + $0x18] sm:$0xff] %v1101_v53 }
 0x389   : > { %1773 = shalt.err (!%p1770_p7)
}
 0x38a   : > { %s1774_s9 = scalar_lea.hbm %s2225_s6, 512  ;;  %s1778_s7 = scalar_lea.hbm %s2278_s3, 1024 }
 0x38b   : > { %p1775_p1 = scmp.ne.s32.totalorder %s2225_s6, %s1774_s9  ;;  %p1779_p3 = scmp.lt.s32.totalorder %s2225_s6, %s2278_s3 }
 0x38c   : > { %p1780_p8 = scmp.lt.s32.totalorder %s1778_s7, %s1774_s9 }
 0x38d   : > { %p1776_p10 = pnand %p1775_p1, %p1932_p9 }
 0x38e   : > { %p1781_p0 = por %p1780_p8, %p1779_p3 }
 0x38f   : > { %p1777_p13 = pneg %p1776_p10 }
 0x391   : > { %p1782_p2 = pnand %p1781_p0, %p1777_p13 }
 0x393   : > { %1785 = shalt.err (!%p1782_p2)
}
 0x394   : > { %s1855_s29 = smov 128   ;;  %s1856_s0 = smov 8  }
 0x395   : > { %1533 = dma.vmem_to_hbm [thread:$0]  (%p1932_p9), %s2227_s5, 512, %s2225_s6, %s1107_s15, %s1855_s29, %s1855_s29, %s1856_s0  }
 0x396 PF: > { %s1138_s30 = sand.u32 1, %s1824_s12   ;;  %p1546_p4 = pnand %p1264_p12, %p1939_p11 }
 0x397   : > { %s1139_s4 = scalar_lea.sflag [#allocation4], %s1138_s30 }
 0x398   : > { %p1547_p5 = pneg %p1546_p4 }
 0x39a   : > { %1819 = dma.done.wait (%p1547_p5), %s1139_s4, 512  }
 0x39b   : > { %1821 = vsyncadd (%p1547_p5), %s1139_s4, 4294966784  ;;  %s22_s17 = sadd.s32 1, %s1844_s17   ;;  %s2297_s25 = sld [smem:[#allocation14_spill]] }
 0x39c   : > { %p19_p6 = scmp.ge.s32.totalorder %s22_s17, 4   ;;  %s2298_s15 = sld [smem:[#allocation12_spill]] }
 0x39d   : > { %s2299_s16 = sld [smem:[#allocation13_spill]]  ;;  %s2300_s12 = smov %s1828_s13 }
 0x39e   : > { %s2301_s13 = smov %s1832_s14  ;;  %21 = sbr.rel (!%p19_p6) target bundleno = 11 (0xb), region = 101 }
 0x3a1   : > { %s2302_s14 = smov %s2297_s25 }
 0x3a3   :  { %1144 = vsyncpa [#allocation3], 1 }
 0x3a4   :  { %1146 = vsyncpa [#allocation3 + $0x1], 1 }
 0x3a5   :  { %1147 = vsyncpa [#allocation6], 1 }
 0x3a6   :  { %1149 = vsyncpa [#allocation6 + $0x1], 1 }
 0x3a7   :  { %1150 = vsyncpa [#allocation4], 1 }
 0x3a8   :  { %1152 = vsyncpa [#allocation4 + $0x1], 1 }

</bundles_post_ra>
